<compile_context>
chip_gen: v7x
topology: tpu7x:2x2x1
jax: 0.10.0
libtpu: 0.0.40
codegen_flags: <defaults>
</compile_context>

<pallas_src>
import numpy as np
import jax
import jax.numpy as jnp
from jax import lax
from jax.experimental import pallas as pl
from jax.experimental.pallas import tpu as pltpu


# ---------------------------------------------------------------------------
# Interpolation matrix for nn.UpsamplingBilinear2d(scale_factor=2)
# (align_corners=True).  Shape (out, in); each row has <= 2 nonzeros.
# ---------------------------------------------------------------------------
def _bilinear_matrix(out_size: int, in_size: int) -> np.ndarray:
    m = np.zeros((out_size, in_size), dtype=np.float32)
    if in_size == 1:
        m[:, 0] = 1.0
        return m
    scale = (in_size - 1) / (out_size - 1)
    for o in range(out_size):
        src = o * scale
        i0 = min(int(np.floor(src)), in_size - 1)
        i1 = min(i0 + 1, in_size - 1)
        frac = src - i0
        m[o, i0] += 1.0 - frac
        m[o, i1] += frac
    return m


# ---------------------------------------------------------------------------
# Expand a (3,3,Cin,Cout) conv weight into 3 banded matrices (one per kernel
# row dy) of shape (Wo*Cin, Wo*Cout), built so that
#     out_rows = sum_dy  pad_rows[dy:dy+Ho, :] @ B[dy]
# is a 'same' (padding=1) 3x3 conv on a lane-dense (row, col*Cin) activation.
# Column zero-padding is implicit (out-of-range taps are simply absent).
# Good for small Cin/Cout; does not scale to Cin >= 128 (see TODO above).
# ---------------------------------------------------------------------------
def _band_matrices(w_hwio, wo: int):
    kh, kw, cin, cout = w_hwio.shape
    assert kh == 3 and kw == 3
    sel = np.zeros((3, wo, wo), np.float32)          # sel[dx, x', x]
    for dx in range(3):
        for x in range(wo):
            xp = x + dx - 1
            if 0 <= xp < wo:
                sel[dx, xp, x] = 1.0
    w32 = w_hwio.astype(jnp.float32)
    bands = jnp.einsum('dpx,ydco->ypcxo', jnp.asarray(sel), w32)
    return bands.reshape(3, wo * cin, wo * cout).astype(jnp.bfloat16)


# ---------------------------------------------------------------------------
# Parameters (bf16 conv weights in HWIO, f32 biases), deterministic init
# ---------------------------------------------------------------------------
def init_unet_up_params(key, in_size, out_size, n=3):
    params = []
    cin = in_size
    for _ in range(n):
        key, k1, k2 = jax.random.split(key, 3)
        w = (jax.random.normal(k1, (3, 3, cin, out_size), jnp.float32) * 0.1
             ).astype(jnp.bfloat16)                   # HWIO, bf16 storage
        b = jax.random.normal(k2, (out_size,), jnp.float32) * 0.1
        params.append((w, b))
        cin = out_size
    return params


# ---------------------------------------------------------------------------
# unetUp forward (is_deconv=False): public wrapper takes/returns NCHW
# ---------------------------------------------------------------------------
def unet_up_forward(inputs0_nchw, skips_nchw, conv_params):
    assert len(conv_params) == 3, "unetConv2 default n=3"
    N, C0, H, W = inputs0_nchw.shape
    Ho, Wo = 2 * H, 2 * W
    Hp = Ho + 2
    bf16 = jnp.bfloat16

    # skips: NCHW -> lane-dense (N, Ho, Wo*Cs)   (concat order matches torch.cat)
    skip_nhwc = jnp.concatenate(
        [jnp.transpose(s, (0, 2, 3, 1)) for s in skips_nchw], axis=-1)
    Cs = skip_nhwc.shape[-1]
    assert skip_nhwc.shape[1] == Ho and skip_nhwc.shape[2] == Wo
    skip_ld = skip_nhwc.reshape(N, Ho, Wo * Cs)

    (w1, b1), (w2, b2), (w3, b3) = conv_params
    Cout = w1.shape[-1]
    assert w1.shape[2] == C0 + Cs

    # inputs0: lane-dense (N, H, W*C0)
    x0_ld = jnp.transpose(inputs0_nchw, (0, 2, 3, 1)).reshape(N, H, W * C0)

    # Separable bilinear x2 (align_corners=True): H direction is a plain
    # (Ho,H) matrix; W direction is folded into lanes via kron(Mw^T, I_C0).
    mh = jnp.asarray(_bilinear_matrix(Ho, H), dtype=bf16)              # (Ho, H)
    mwk = jnp.asarray(
        np.kron(_bilinear_matrix(Wo, W).T, np.eye(C0, dtype=np.float32)),
        dtype=bf16)                                                    # (W*C0, Wo*C0)

    # conv1 weight split along Cin: [upsampled half ; skip half] stacked along
    # K so the channel concat is just two adjacent lane ranges in scratch.
    band1 = jnp.concatenate([_band_matrices(w1[:, :, :C0, :], Wo),
                             _band_matrices(w1[:, :, C0:, :], Wo)], axis=1)
    band2 = _band_matrices(w2, Wo)
    band3 = _band_matrices(w3, Wo)
    b1_ld = jnp.tile(b1, Wo).reshape(1, Wo * Cout)       # lane-tiled f32 biases
    b2_ld = jnp.tile(b2, Wo).reshape(1, Wo * Cout)
    b3_ld = jnp.tile(b3, Wo).reshape(1, Wo * Cout)

    UC = Wo * C0                    # lane width of the upsampled half
    SC = Wo * Cs                    # lane width of the skip half
    WCAT = UC + SC                  # conv1 input lane width
    WOUT = Wo * Cout                # conv2/3 input + output lane width

    def kernel(mh_ref, mwk_ref, x0_ref, skip_ref,
               w1_ref, bias1_ref, w2_ref, bias2_ref, w3_ref, bias3_ref,
               o_ref, pad_cat, pad_mid):
        # ---- zero ONLY the two halo rows (interiors are fully overwritten) --
        pad_cat[0:1, :] = jnp.zeros((1, WCAT), dtype=bf16)
        pad_cat[Hp - 1:Hp, :] = jnp.zeros((1, WCAT), dtype=bf16)
        pad_mid[0:1, :] = jnp.zeros((1, WOUT), dtype=bf16)
        pad_mid[Hp - 1:Hp, :] = jnp.zeros((1, WOUT), dtype=bf16)

        # ---- bilinear x2 upsample: W direction (lane-folded kron), then H ---
        xw = jnp.dot(x0_ref[0].astype(bf16), mwk_ref[...],
                     preferred_element_type=jnp.float32)          # (H, Wo*C0)
        up = jnp.dot(mh_ref[...], xw.astype(bf16),
                     preferred_element_type=jnp.float32)          # (Ho, Wo*C0)

        # implicit concat: upsampled and skip halves side by side along lanes
        pad_cat[1:Ho + 1, 0:UC] = up.astype(bf16)
        pad_cat[1:Ho + 1, UC:WCAT] = skip_ref[0].astype(bf16)

        # ---- 3x3 'same' conv = 3 accumulating banded lane-dense matmuls -----
        def conv3x3(pad, w_ref):
            acc = jnp.dot(pad[0:Ho, :], w_ref[0],
                          preferred_element_type=jnp.float32)
            acc = acc + jnp.dot(pad[1:Ho + 1, :], w_ref[1],
                                preferred_element_type=jnp.float32)
            acc = acc + jnp.dot(pad[2:Ho + 2, :], w_ref[2],
                                preferred_element_type=jnp.float32)
            return acc                                            # (Ho, Wo*Cout)

        # conv1 + ReLU
        act = jnp.maximum(conv3x3(pad_cat, w1_ref) + bias1_ref[...], 0.0)
        pad_mid[1:Ho + 1, :] = act.astype(bf16)

        # conv2 + ReLU
        act = jnp.maximum(conv3x3(pad_mid, w2_ref) + bias2_ref[...], 0.0)
        pad_mid[1:Ho + 1, :] = act.astype(bf16)

        # conv3 + ReLU -> lane-dense bf16 output
        act = jnp.maximum(conv3x3(pad_mid, w3_ref) + bias3_ref[...], 0.0)
        o_ref[0] = act.astype(o_ref.dtype)

    out_ld = pl.pallas_call(
        kernel,
        out_shape=jax.ShapeDtypeStruct((N, Ho, WOUT), bf16),
        grid=(N,),
        in_specs=[
            pl.BlockSpec((Ho, H), lambda n: (0, 0)),                # Mh
            pl.BlockSpec((W * C0, UC), lambda n: (0, 0)),           # kron(Mw^T,I)
            pl.BlockSpec((1, H, W * C0), lambda n: (n, 0, 0)),      # inputs0
            pl.BlockSpec((1, Ho, SC), lambda n: (n, 0, 0)),         # skip
            pl.BlockSpec((3, WCAT, WOUT), lambda n: (0, 0, 0)),     # conv1 bands
            pl.BlockSpec((1, WOUT), lambda n: (0, 0)),              # bias1
            pl.BlockSpec((3, WOUT, WOUT), lambda n: (0, 0, 0)),     # conv2 bands
            pl.BlockSpec((1, WOUT), lambda n: (0, 0)),              # bias2
            pl.BlockSpec((3, WOUT, WOUT), lambda n: (0, 0, 0)),     # conv3 bands
            pl.BlockSpec((1, WOUT), lambda n: (0, 0)),              # bias3
        ],
        out_specs=pl.BlockSpec((1, Ho, WOUT), lambda n: (n, 0, 0)),
        scratch_shapes=[
            pltpu.VMEM((Hp, WCAT), bf16),   # row-padded [upsampled | skip]
            pltpu.VMEM((Hp, WOUT), bf16),   # row-padded conv1 / conv2 output
        ],
        compiler_params=pltpu.CompilerParams(
            dimension_semantics=("parallel",),
            vmem_limit_bytes=32 * 1024 * 1024,
        ),
    )(mh, mwk, x0_ld, skip_ld, band1, b1_ld, band2, b2_ld, band3, b3_ld)

    out = out_ld.reshape(N, Ho, Wo, Cout).astype(jnp.float32)
    return jnp.transpose(out, (0, 3, 1, 2))                 # NHWC -> NCHW


# ---------------------------------------------------------------------------
# Pure-JAX reference (f32 math, same bf16-stored weights)
# ---------------------------------------------------------------------------
def reference_forward(inputs0, skips, conv_params):
    N, C, H, W = inputs0.shape
    mh = jnp.asarray(_bilinear_matrix(2 * H, H))
    mw = jnp.asarray(_bilinear_matrix(2 * W, W))
    up = jnp.einsum('nchw,Hh,Ww->ncHW', inputs0, mh, mw)
    x = jnp.concatenate([up] + list(skips), axis=1)
    for (w_hwio, b) in conv_params:
        w_oihw = jnp.transpose(w_hwio.astype(jnp.float32), (3, 2, 0, 1))
        x = lax.conv_general_dilated(
            x, w_oihw, window_strides=(1, 1), padding=((1, 1), (1, 1)),
            dimension_numbers=('NCHW', 'OIHW', 'NCHW'))
        x = jnp.maximum(x + b[None, :, None, None], 0.0)
    return x


if __name__ == "__main__":
    key = jax.random.PRNGKey(0)
    in_size, out_size = 8, 4        # unetUp(in_size=8, out_size=4, is_deconv=False)
    N, H, W = 2, 8, 8               # inputs0 spatial; skip is 2x spatial

    k0, k1, k2 = jax.random.split(key, 3)
    inputs0 = jax.random.normal(k0, (N, out_size, H, W), jnp.float32)           # NCHW
    skip0 = jax.random.normal(k1, (N, in_size - out_size, 2 * H, 2 * W),
                              jnp.float32)                                       # NCHW
    params = init_unet_up_params(k2, in_size, out_size, n=3)

    out = jax.block_until_ready(unet_up_forward(inputs0, [skip0], params))
    ref = jax.block_until_ready(reference_forward(inputs0, [skip0], params))

    assert out.shape == (N, out_size, 2 * H, 2 * W), out.shape
    err = float(np.max(np.abs(np.asarray(out) - np.asarray(ref))))
    # bf16 matmul operands / bf16 activation & output storage vs f32 reference.
    assert np.allclose(np.asarray(out), np.asarray(ref), atol=5e-2, rtol=5e-2), err

    print("KERNEL_OK")
</pallas_src>

<mosaic_0001>
module attributes {stable_mosaic.version = 11 : i64} {
  func.func @kernel(%arg0: i32, %arg1: memref<16x8xbf16, #tpu.memory_space<vmem>>, %arg2: memref<32x64xbf16, #tpu.memory_space<vmem>>, %arg3: memref<1x8x32xf32, #tpu.memory_space<vmem>>, %arg4: memref<1x16x64xf32, #tpu.memory_space<vmem>>, %arg5: memref<3x128x64xbf16, #tpu.memory_space<vmem>>, %arg6: memref<1x64xf32, #tpu.memory_space<vmem>>, %arg7: memref<3x64x64xbf16, #tpu.memory_space<vmem>>, %arg8: memref<1x64xf32, #tpu.memory_space<vmem>>, %arg9: memref<3x64x64xbf16, #tpu.memory_space<vmem>>, %arg10: memref<1x64xf32, #tpu.memory_space<vmem>>, %arg11: memref<1x16x64xbf16, #tpu.memory_space<vmem>>, %arg12: memref<18x128xbf16, #tpu.memory_space<vmem>>, %arg13: memref<18x64xbf16, #tpu.memory_space<vmem>>) attributes {dimension_semantics = [#tpu.dimension_semantics<parallel>], iteration_bounds = array<i64: 2>, scalar_prefetch = 0 : i64, scratch_operands = 2 : i64, tpu.core_type = #tpu.core_type<tc>, window_params = [{pipeline_mode = #tpu.pipeline_mode<synchronous>, transform_indices = @transform_0, window_bounds = array<i64: 16, 8>}, {pipeline_mode = #tpu.pipeline_mode<synchronous>, transform_indices = @transform_1, window_bounds = array<i64: 32, 64>}, {transform_indices = @transform_2, window_bounds = array<i64: 1, 8, 32>}, {transform_indices = @transform_3, window_bounds = array<i64: 1, 16, 64>}, {pipeline_mode = #tpu.pipeline_mode<synchronous>, transform_indices = @transform_4, window_bounds = array<i64: 3, 128, 64>}, {pipeline_mode = #tpu.pipeline_mode<synchronous>, transform_indices = @transform_5, window_bounds = array<i64: 1, 64>}, {pipeline_mode = #tpu.pipeline_mode<synchronous>, transform_indices = @transform_6, window_bounds = array<i64: 3, 64, 64>}, {pipeline_mode = #tpu.pipeline_mode<synchronous>, transform_indices = @transform_7, window_bounds = array<i64: 1, 64>}, {pipeline_mode = #tpu.pipeline_mode<synchronous>, transform_indices = @transform_8, window_bounds = array<i64: 3, 64, 64>}, {pipeline_mode = #tpu.pipeline_mode<synchronous>, transform_indices = @transform_9, window_bounds = array<i64: 1, 64>}, {transform_indices = @transform_10, window_bounds = array<i64: 1, 16, 64>}]} {
    %cst = arith.constant 0.000000e+00 : bf16
    %0 = vector.broadcast %cst : bf16 to vector<1x128xbf16>
    %c0 = arith.constant 0 : index
    %c0_0 = arith.constant 0 : index
    %1 = vector.load %arg12[%c0, %c0_0] : memref<18x128xbf16, #tpu.memory_space<vmem>>, vector<1x128xbf16>
    tpu.vector_store %arg12[%c0, %c0_0], %0 {strides = array<i32>} : memref<18x128xbf16, #tpu.memory_space<vmem>>, vector<1x128xbf16>,
    %cst_1 = arith.constant 0.000000e+00 : bf16
    %2 = vector.broadcast %cst_1 : bf16 to vector<1x128xbf16>
    %c17 = arith.constant 17 : index
    %c0_2 = arith.constant 0 : index
    %3 = vector.load %arg12[%c17, %c0_2] : memref<18x128xbf16, #tpu.memory_space<vmem>>, vector<1x128xbf16>
    tpu.vector_store %arg12[%c17, %c0_2], %2 {strides = array<i32>} : memref<18x128xbf16, #tpu.memory_space<vmem>>, vector<1x128xbf16>,
    %cst_3 = arith.constant 0.000000e+00 : bf16
    %4 = vector.broadcast %cst_3 : bf16 to vector<1x64xbf16>
    %c0_4 = arith.constant 0 : index
    %c0_5 = arith.constant 0 : index
    %5 = vector.load %arg13[%c0_4, %c0_5] : memref<18x64xbf16, #tpu.memory_space<vmem>>, vector<1x64xbf16>
    tpu.vector_store %arg13[%c0_4, %c0_5], %4 {strides = array<i32>} : memref<18x64xbf16, #tpu.memory_space<vmem>>, vector<1x64xbf16>,
    %cst_6 = arith.constant 0.000000e+00 : bf16
    %6 = vector.broadcast %cst_6 : bf16 to vector<1x64xbf16>
    %c17_7 = arith.constant 17 : index
    %c0_8 = arith.constant 0 : index
    %7 = vector.load %arg13[%c17_7, %c0_8] : memref<18x64xbf16, #tpu.memory_space<vmem>>, vector<1x64xbf16>
    tpu.vector_store %arg13[%c17_7, %c0_8], %6 {strides = array<i32>} : memref<18x64xbf16, #tpu.memory_space<vmem>>, vector<1x64xbf16>,
    %c0_9 = arith.constant 0 : index
    %c0_10 = arith.constant 0 : index
    %c0_11 = arith.constant 0 : index
    %8 = vector.load %arg3[%c0_9, %c0_10, %c0_11] : memref<1x8x32xf32, #tpu.memory_space<vmem>>, vector<1x8x32xf32>
    %9 = vector.shape_cast %8 : vector<1x8x32xf32> to vector<8x32xf32>
    %10 = arith.truncf %9 : vector<8x32xf32> to vector<8x32xbf16>
    %c0_12 = arith.constant 0 : index
    %c0_13 = arith.constant 0 : index
    %11 = vector.load %arg2[%c0_12, %c0_13] : memref<32x64xbf16, #tpu.memory_space<vmem>>, vector<32x64xbf16>
    %cst_14 = arith.constant dense<0.000000e+00> : vector<8x64xf32>
    %12 = tpu.matmul %10, %11, %cst_14 {dimension_numbers = #tpu.dot_dimension_numbers<[1], [0], [0], [1], [0, 0, 1, 1], [], []>} : vector<8x32xbf16>, vector<32x64xbf16>, vector<8x64xf32> -> vector<8x64xf32>
    %c0_15 = arith.constant 0 : index
    %c0_16 = arith.constant 0 : index
    %13 = vector.load %arg1[%c0_15, %c0_16] : memref<16x8xbf16, #tpu.memory_space<vmem>>, vector<16x8xbf16>
    %14 = arith.truncf %12 : vector<8x64xf32> to vector<8x64xbf16>
    %cst_17 = arith.constant dense<0.000000e+00> : vector<16x64xf32>
    %15 = tpu.matmul %13, %14, %cst_17 {dimension_numbers = #tpu.dot_dimension_numbers<[1], [0], [0], [1], [0, 0, 1, 1], [], []>} : vector<16x8xbf16>, vector<8x64xbf16>, vector<16x64xf32> -> vector<16x64xf32>
    %16 = arith.truncf %15 : vector<16x64xf32> to vector<16x64xbf16>
    %c1 = arith.constant 1 : index
    %c0_18 = arith.constant 0 : index
    %17 = vector.load %arg12[%c1, %c0_18] : memref<18x128xbf16, #tpu.memory_space<vmem>>, vector<16x64xbf16>
    tpu.vector_store %arg12[%c1, %c0_18], %16 {strides = array<i32>} : memref<18x128xbf16, #tpu.memory_space<vmem>>, vector<16x64xbf16>,
    %c0_19 = arith.constant 0 : index
    %c0_20 = arith.constant 0 : index
    %c0_21 = arith.constant 0 : index
    %18 = vector.load %arg4[%c0_19, %c0_20, %c0_21] : memref<1x16x64xf32, #tpu.memory_space<vmem>>, vector<1x16x64xf32>
    %19 = vector.shape_cast %18 : vector<1x16x64xf32> to vector<16x64xf32>
    %20 = arith.truncf %19 : vector<16x64xf32> to vector<16x64xbf16>
    %c1_22 = arith.constant 1 : index
    %c64 = arith.constant 64 : index
    %21 = vector.load %arg12[%c1_22, %c64] : memref<18x128xbf16, #tpu.memory_space<vmem>>, vector<16x64xbf16>
    tpu.vector_store %arg12[%c1_22, %c64], %20 {strides = array<i32>} : memref<18x128xbf16, #tpu.memory_space<vmem>>, vector<16x64xbf16>,
    %c0_23 = arith.constant 0 : index
    %c0_24 = arith.constant 0 : index
    %22 = vector.load %arg12[%c0_23, %c0_24] : memref<18x128xbf16, #tpu.memory_space<vmem>>, vector<16x128xbf16>
    %c0_25 = arith.constant 0 : index
    %c0_26 = arith.constant 0 : index
    %c0_27 = arith.constant 0 : index
    %23 = vector.load %arg5[%c0_25, %c0_26, %c0_27] : memref<3x128x64xbf16, #tpu.memory_space<vmem>>, vector<1x128x64xbf16>
    %24 = vector.shape_cast %23 : vector<1x128x64xbf16> to vector<128x64xbf16>
    %cst_28 = arith.constant dense<0.000000e+00> : vector<16x64xf32>
    %25 = tpu.matmul %22, %24, %cst_28 {dimension_numbers = #tpu.dot_dimension_numbers<[1], [0], [0], [1], [0, 0, 1, 1], [], []>} : vector<16x128xbf16>, vector<128x64xbf16>, vector<16x64xf32> -> vector<16x64xf32>
    %c1_29 = arith.constant 1 : index
    %c0_30 = arith.constant 0 : index
    %26 = vector.load %arg12[%c1_29, %c0_30] : memref<18x128xbf16, #tpu.memory_space<vmem>>, vector<16x128xbf16>
    %c1_31 = arith.constant 1 : index
    %c0_32 = arith.constant 0 : index
    %c0_33 = arith.constant 0 : index
    %27 = vector.load %arg5[%c1_31, %c0_32, %c0_33] : memref<3x128x64xbf16, #tpu.memory_space<vmem>>, vector<1x128x64xbf16>
    %28 = vector.shape_cast %27 : vector<1x128x64xbf16> to vector<128x64xbf16>
    %cst_34 = arith.constant dense<0.000000e+00> : vector<16x64xf32>
    %29 = tpu.matmul %26, %28, %cst_34 {dimension_numbers = #tpu.dot_dimension_numbers<[1], [0], [0], [1], [0, 0, 1, 1], [], []>} : vector<16x128xbf16>, vector<128x64xbf16>, vector<16x64xf32> -> vector<16x64xf32>
    %30 = arith.addf %25, %29 : vector<16x64xf32>
    %c2 = arith.constant 2 : index
    %c0_35 = arith.constant 0 : index
    %31 = vector.load %arg12[%c2, %c0_35] : memref<18x128xbf16, #tpu.memory_space<vmem>>, vector<16x128xbf16>
    %c2_36 = arith.constant 2 : index
    %c0_37 = arith.constant 0 : index
    %c0_38 = arith.constant 0 : index
    %32 = vector.load %arg5[%c2_36, %c0_37, %c0_38] : memref<3x128x64xbf16, #tpu.memory_space<vmem>>, vector<1x128x64xbf16>
    %33 = vector.shape_cast %32 : vector<1x128x64xbf16> to vector<128x64xbf16>
    %cst_39 = arith.constant dense<0.000000e+00> : vector<16x64xf32>
    %34 = tpu.matmul %31, %33, %cst_39 {dimension_numbers = #tpu.dot_dimension_numbers<[1], [0], [0], [1], [0, 0, 1, 1], [], []>} : vector<16x128xbf16>, vector<128x64xbf16>, vector<16x64xf32> -> vector<16x64xf32>
    %35 = arith.addf %30, %34 : vector<16x64xf32>
    %c0_40 = arith.constant 0 : index
    %c0_41 = arith.constant 0 : index
    %36 = vector.load %arg6[%c0_40, %c0_41] : memref<1x64xf32, #tpu.memory_space<vmem>>, vector<1x64xf32>
    %37 = vector.broadcast %36 : vector<1x64xf32> to vector<16x64xf32>
    %38 = arith.addf %35, %37 : vector<16x64xf32>
    %cst_42 = arith.constant 0.000000e+00 : f32
    %39 = vector.broadcast %cst_42 : f32 to vector<16x64xf32>
    %40 = arith.maximumf %38, %39 : vector<16x64xf32>
    %41 = arith.truncf %40 : vector<16x64xf32> to vector<16x64xbf16>
    %c1_43 = arith.constant 1 : index
    %c0_44 = arith.constant 0 : index
    %42 = vector.load %arg13[%c1_43, %c0_44] : memref<18x64xbf16, #tpu.memory_space<vmem>>, vector<16x64xbf16>
    tpu.vector_store %arg13[%c1_43, %c0_44], %41 {strides = array<i32>} : memref<18x64xbf16, #tpu.memory_space<vmem>>, vector<16x64xbf16>,
    %c0_45 = arith.constant 0 : index
    %c0_46 = arith.constant 0 : index
    %43 = vector.load %arg13[%c0_45, %c0_46] : memref<18x64xbf16, #tpu.memory_space<vmem>>, vector<16x64xbf16>
    %c0_47 = arith.constant 0 : index
    %c0_48 = arith.constant 0 : index
    %c0_49 = arith.constant 0 : index
    %44 = vector.load %arg7[%c0_47, %c0_48, %c0_49] : memref<3x64x64xbf16, #tpu.memory_space<vmem>>, vector<1x64x64xbf16>
    %45 = vector.shape_cast %44 : vector<1x64x64xbf16> to vector<64x64xbf16>
    %cst_50 = arith.constant dense<0.000000e+00> : vector<16x64xf32>
    %46 = tpu.matmul %43, %45, %cst_50 {dimension_numbers = #tpu.dot_dimension_numbers<[1], [0], [0], [1], [0, 0, 1, 1], [], []>} : vector<16x64xbf16>, vector<64x64xbf16>, vector<16x64xf32> -> vector<16x64xf32>
    %c1_51 = arith.constant 1 : index
    %c0_52 = arith.constant 0 : index
    %47 = vector.load %arg13[%c1_51, %c0_52] : memref<18x64xbf16, #tpu.memory_space<vmem>>, vector<16x64xbf16>
    %c1_53 = arith.constant 1 : index
    %c0_54 = arith.constant 0 : index
    %c0_55 = arith.constant 0 : index
    %48 = vector.load %arg7[%c1_53, %c0_54, %c0_55] : memref<3x64x64xbf16, #tpu.memory_space<vmem>>, vector<1x64x64xbf16>
    %49 = vector.shape_cast %48 : vector<1x64x64xbf16> to vector<64x64xbf16>
    %cst_56 = arith.constant dense<0.000000e+00> : vector<16x64xf32>
    %50 = tpu.matmul %47, %49, %cst_56 {dimension_numbers = #tpu.dot_dimension_numbers<[1], [0], [0], [1], [0, 0, 1, 1], [], []>} : vector<16x64xbf16>, vector<64x64xbf16>, vector<16x64xf32> -> vector<16x64xf32>
    %51 = arith.addf %46, %50 : vector<16x64xf32>
    %c2_57 = arith.constant 2 : index
    %c0_58 = arith.constant 0 : index
    %52 = vector.load %arg13[%c2_57, %c0_58] : memref<18x64xbf16, #tpu.memory_space<vmem>>, vector<16x64xbf16>
    %c2_59 = arith.constant 2 : index
    %c0_60 = arith.constant 0 : index
    %c0_61 = arith.constant 0 : index
    %53 = vector.load %arg7[%c2_59, %c0_60, %c0_61] : memref<3x64x64xbf16, #tpu.memory_space<vmem>>, vector<1x64x64xbf16>
    %54 = vector.shape_cast %53 : vector<1x64x64xbf16> to vector<64x64xbf16>
    %cst_62 = arith.constant dense<0.000000e+00> : vector<16x64xf32>
    %55 = tpu.matmul %52, %54, %cst_62 {dimension_numbers = #tpu.dot_dimension_numbers<[1], [0], [0], [1], [0, 0, 1, 1], [], []>} : vector<16x64xbf16>, vector<64x64xbf16>, vector<16x64xf32> -> vector<16x64xf32>
    %56 = arith.addf %51, %55 : vector<16x64xf32>
    %c0_63 = arith.constant 0 : index
    %c0_64 = arith.constant 0 : index
    %57 = vector.load %arg8[%c0_63, %c0_64] : memref<1x64xf32, #tpu.memory_space<vmem>>, vector<1x64xf32>
    %58 = vector.broadcast %57 : vector<1x64xf32> to vector<16x64xf32>
    %59 = arith.addf %56, %58 : vector<16x64xf32>
    %cst_65 = arith.constant 0.000000e+00 : f32
    %60 = vector.broadcast %cst_65 : f32 to vector<16x64xf32>
    %61 = arith.maximumf %59, %60 : vector<16x64xf32>
    %62 = arith.truncf %61 : vector<16x64xf32> to vector<16x64xbf16>
    %c1_66 = arith.constant 1 : index
    %c0_67 = arith.constant 0 : index
    %63 = vector.load %arg13[%c1_66, %c0_67] : memref<18x64xbf16, #tpu.memory_space<vmem>>, vector<16x64xbf16>
    tpu.vector_store %arg13[%c1_66, %c0_67], %62 {strides = array<i32>} : memref<18x64xbf16, #tpu.memory_space<vmem>>, vector<16x64xbf16>,
    %c0_68 = arith.constant 0 : index
    %c0_69 = arith.constant 0 : index
    %64 = vector.load %arg13[%c0_68, %c0_69] : memref<18x64xbf16, #tpu.memory_space<vmem>>, vector<16x64xbf16>
    %c0_70 = arith.constant 0 : index
    %c0_71 = arith.constant 0 : index
    %c0_72 = arith.constant 0 : index
    %65 = vector.load %arg9[%c0_70, %c0_71, %c0_72] : memref<3x64x64xbf16, #tpu.memory_space<vmem>>, vector<1x64x64xbf16>
    %66 = vector.shape_cast %65 : vector<1x64x64xbf16> to vector<64x64xbf16>
    %cst_73 = arith.constant dense<0.000000e+00> : vector<16x64xf32>
    %67 = tpu.matmul %64, %66, %cst_73 {dimension_numbers = #tpu.dot_dimension_numbers<[1], [0], [0], [1], [0, 0, 1, 1], [], []>} : vector<16x64xbf16>, vector<64x64xbf16>, vector<16x64xf32> -> vector<16x64xf32>
    %c1_74 = arith.constant 1 : index
    %c0_75 = arith.constant 0 : index
    %68 = vector.load %arg13[%c1_74, %c0_75] : memref<18x64xbf16, #tpu.memory_space<vmem>>, vector<16x64xbf16>
    %c1_76 = arith.constant 1 : index
    %c0_77 = arith.constant 0 : index
    %c0_78 = arith.constant 0 : index
    %69 = vector.load %arg9[%c1_76, %c0_77, %c0_78] : memref<3x64x64xbf16, #tpu.memory_space<vmem>>, vector<1x64x64xbf16>
    %70 = vector.shape_cast %69 : vector<1x64x64xbf16> to vector<64x64xbf16>
    %cst_79 = arith.constant dense<0.000000e+00> : vector<16x64xf32>
    %71 = tpu.matmul %68, %70, %cst_79 {dimension_numbers = #tpu.dot_dimension_numbers<[1], [0], [0], [1], [0, 0, 1, 1], [], []>} : vector<16x64xbf16>, vector<64x64xbf16>, vector<16x64xf32> -> vector<16x64xf32>
    %72 = arith.addf %67, %71 : vector<16x64xf32>
    %c2_80 = arith.constant 2 : index
    %c0_81 = arith.constant 0 : index
    %73 = vector.load %arg13[%c2_80, %c0_81] : memref<18x64xbf16, #tpu.memory_space<vmem>>, vector<16x64xbf16>
    %c2_82 = arith.constant 2 : index
    %c0_83 = arith.constant 0 : index
    %c0_84 = arith.constant 0 : index
    %74 = vector.load %arg9[%c2_82, %c0_83, %c0_84] : memref<3x64x64xbf16, #tpu.memory_space<vmem>>, vector<1x64x64xbf16>
    %75 = vector.shape_cast %74 : vector<1x64x64xbf16> to vector<64x64xbf16>
    %cst_85 = arith.constant dense<0.000000e+00> : vector<16x64xf32>
    %76 = tpu.matmul %73, %75, %cst_85 {dimension_numbers = #tpu.dot_dimension_numbers<[1], [0], [0], [1], [0, 0, 1, 1], [], []>} : vector<16x64xbf16>, vector<64x64xbf16>, vector<16x64xf32> -> vector<16x64xf32>
    %77 = arith.addf %72, %76 : vector<16x64xf32>
    %c0_86 = arith.constant 0 : index
    %c0_87 = arith.constant 0 : index
    %78 = vector.load %arg10[%c0_86, %c0_87] : memref<1x64xf32, #tpu.memory_space<vmem>>, vector<1x64xf32>
    %79 = vector.broadcast %78 : vector<1x64xf32> to vector<16x64xf32>
    %80 = arith.addf %77, %79 : vector<16x64xf32>
    %cst_88 = arith.constant 0.000000e+00 : f32
    %81 = vector.broadcast %cst_88 : f32 to vector<16x64xf32>
    %82 = arith.maximumf %80, %81 : vector<16x64xf32>
    %83 = arith.truncf %82 : vector<16x64xf32> to vector<16x64xbf16>
    %c0_89 = arith.constant 0 : index
    %c0_90 = arith.constant 0 : index
    %c0_91 = arith.constant 0 : index
    %84 = vector.load %arg11[%c0_89, %c0_90, %c0_91] : memref<1x16x64xbf16, #tpu.memory_space<vmem>>, vector<1x16x64xbf16>
    %85 = vector.shape_cast %84 : vector<1x16x64xbf16> to vector<16x64xbf16>
    %86 = vector.shape_cast %83 : vector<16x64xbf16> to vector<1x16x64xbf16>
    tpu.vector_store %arg11[%c0_89, %c0_90, %c0_91], %86 {strides = array<i32>} : memref<1x16x64xbf16, #tpu.memory_space<vmem>>, vector<1x16x64xbf16>,
    return
  }
  func.func @transform_0(%arg0: i32) -> (i32, i32) {
    %c0_i32 = arith.constant 0 : i32
    %c0_i32_0 = arith.constant 0 : i32
    %c0_i32_1 = arith.constant 0 : i32
    return %c0_i32, %c0_i32_0 : i32, i32
  }
  func.func @transform_1(%arg0: i32) -> (i32, i32) {
    %c0_i32 = arith.constant 0 : i32
    %c0_i32_0 = arith.constant 0 : i32
    %c0_i32_1 = arith.constant 0 : i32
    return %c0_i32, %c0_i32_0 : i32, i32
  }
  func.func @transform_2(%arg0: i32) -> (i32, i32, i32) {
    %c0_i32 = arith.constant 0 : i32
    %c0_i32_0 = arith.constant 0 : i32
    %c0_i32_1 = arith.constant 0 : i32
    return %arg0, %c0_i32, %c0_i32_0 : i32, i32, i32
  }
  func.func @transform_3(%arg0: i32) -> (i32, i32, i32) {
    %c0_i32 = arith.constant 0 : i32
    %c0_i32_0 = arith.constant 0 : i32
    %c0_i32_1 = arith.constant 0 : i32
    return %arg0, %c0_i32, %c0_i32_0 : i32, i32, i32
  }
  func.func @transform_4(%arg0: i32) -> (i32, i32, i32) {
    %c0_i32 = arith.constant 0 : i32
    %c0_i32_0 = arith.constant 0 : i32
    %c0_i32_1 = arith.constant 0 : i32
    %c0_i32_2 = arith.constant 0 : i32
    return %c0_i32, %c0_i32_0, %c0_i32_1 : i32, i32, i32
  }
  func.func @transform_5(%arg0: i32) -> (i32, i32) {
    %c0_i32 = arith.constant 0 : i32
    %c0_i32_0 = arith.constant 0 : i32
    %c0_i32_1 = arith.constant 0 : i32
    return %c0_i32, %c0_i32_0 : i32, i32
  }
  func.func @transform_6(%arg0: i32) -> (i32, i32, i32) {
    %c0_i32 = arith.constant 0 : i32
    %c0_i32_0 = arith.constant 0 : i32
    %c0_i32_1 = arith.constant 0 : i32
    %c0_i32_2 = arith.constant 0 : i32
    return %c0_i32, %c0_i32_0, %c0_i32_1 : i32, i32, i32
  }
  func.func @transform_7(%arg0: i32) -> (i32, i32) {
    %c0_i32 = arith.constant 0 : i32
    %c0_i32_0 = arith.constant 0 : i32
    %c0_i32_1 = arith.constant 0 : i32
    return %c0_i32, %c0_i32_0 : i32, i32
  }
  func.func @transform_8(%arg0: i32) -> (i32, i32, i32) {
    %c0_i32 = arith.constant 0 : i32
    %c0_i32_0 = arith.constant 0 : i32
    %c0_i32_1 = arith.constant 0 : i32
    %c0_i32_2 = arith.constant 0 : i32
    return %c0_i32, %c0_i32_0, %c0_i32_1 : i32, i32, i32
  }
  func.func @transform_9(%arg0: i32) -> (i32, i32) {
    %c0_i32 = arith.constant 0 : i32
    %c0_i32_0 = arith.constant 0 : i32
    %c0_i32_1 = arith.constant 0 : i32
    return %c0_i32, %c0_i32_0 : i32, i32
  }
  func.func @transform_10(%arg0: i32) -> (i32, i32, i32) {
    %c0_i32 = arith.constant 0 : i32
    %c0_i32_0 = arith.constant 0 : i32
    %c0_i32_1 = arith.constant 0 : i32
    return %arg0, %c0_i32, %c0_i32_0 : i32, i32, i32
  }
}

</mosaic_0001>

<bundles_post_ra>
// kernel: tpu_custom_call.1
= control target key start
LH: loop header
LB: loop body
LE: loop exit
PB: predicated region body
PF: predicated region fallthrough
CT: control target
= control target key end

     0   :  { %15 = vsyncpa [#allocation5], 0  ;;  %s2687_s0 = inlined_call_operand.vmem [shape: bf16[16,8], index: 0, kind: input, shape index: {}]   ;;  %s2688_s1 = inlined_call_operand.vmem [shape: bf16[32,64], index: 1, kind: input, shape index: {}]   ;;  %s2689_s2 = inlined_call_operand.vmem [shape: f32[2,8,32], index: 2, kind: input, shape index: {}]   ;;  %s2690_s3 = inlined_call_operand.vmem [shape: f32[2,16,64], index: 3, kind: input, shape index: {}]   ;;  %s2691_s4 = inlined_call_operand.vmem [shape: bf16[3,128,64], index: 4, kind: input, shape index: {}]   ;;  %s2692_s5 = inlined_call_operand.vmem [shape: f32[1,64], index: 5, kind: input, shape index: {}]   ;;  %s2693_s6 = inlined_call_operand.vmem [shape: bf16[3,64,64], index: 6, kind: input, shape index: {}]   ;;  %s2694_s7 = inlined_call_operand.vmem [shape: f32[1,64], index: 7, kind: input, shape index: {}]   ;;  %s2695_s8 = inlined_call_operand.vmem [shape: bf16[3,64,64], index: 8, kind: input, shape index: {}]   ;;  %s2696_s9 = inlined_call_operand.vmem [shape: f32[1,64], index: 9, kind: input, shape index: {}]   ;;  %s2697_s10 = inlined_call_operand.hbm [shape: bf16[2,16,64], index: 10, kind: output, shape index: {}]  }
   0x1   :  { %17 = vsyncpa [#allocation5 + $0x1], 0  ;;  %s2277_s13 = smov 0   ;;  %s2279_s14 = smov 0  }
   0x2   :  { %s2281_s15 = smov 0   ;;  %s2283_s16 = smov 0  }
   0x3 LB: > { %s2298_s17 = sadd.s32 4294967295, %s2215_s16   ;;  %s1672_s18 = sadd.s32 4294967294, %s2215_s16   ;;  %s2215_s16 = sphi %s2283_s16, %s2709_s16   ;;  %s2211_s15 = sphi %s2281_s15, %s2708_s15   ;;  %s2207_s14 = sphi %s2279_s14, %s2707_s14   ;;  %s2203_s13 = sphi %s2277_s13, %s2706_s13  }
   0x4   : > { %s2302_s19 = sadd.s32 1, %s2215_s16   ;;  %s250_s20 = sadd.s32 1, %s2211_s15 }
   0x5   : > { %s247_s21 = ssub.s32 %s2215_s16, %s2302_s19  ;;  %p260_p0 = scmp.ne.s32.totalorder %s2211_s15, %s2207_s14 }
   0x6   : > { %p248_p1 = scmp.eq.s32.totalorder %s247_s21, 0  ;;  %p261_p2 = scmp.eq.s32.totalorder %s2298_s17, 1 }
   0x7   : > { %p266_p3 = scmp.ne.s32.totalorder %s2207_s14, %s2203_s13  ;;  %p267_p4 = scmp.eq.s32.totalorder %s1672_s18, 1 }
   0x8   : > { %s2313_s22 = scalar_select %p248_p1, %s2211_s15, %s250_s20  }
   0x9   : > { %p2315_p5 = por %p261_p2, %p260_p0  ;;  %p2319_p6 = por %p267_p4, %p266_p3 }
   0xa   : > { %p1675_p7 = scmp.ge.s32.totalorder %s2215_s16, 1  ;;  %p324_p8 = scmp.lt.s32.totalorder %s2215_s16, 3 }
   0xc   : > { %p325_p9 = pnand %p1675_p7, %p324_p8 }
   0xd   : > { %v2093_v0 = vld [vmem:[%s2688_s1] sm:$0xff] (!%p325_p9)   ;;  %v2217_v1 = vmov (!%p325_p9), 0.0   ;;  %v2094_v2 = vld [vmem:[%s2688_s1 + $0x8] sm:$0xff] (!%p325_p9)   ;;  %vm2218_vm0 = vmmov (!%p325_p9), 0   ;;  %p366_p10 = scmp.lt.s32.totalorder (!%p325_p9), %s2298_s17, 1  ;;  %vm414_vm1 = vcmask (!%p325_p9), 261120  }
   0xe   : > { %328 = sbr.rel (%p325_p9) target bundleno = 1288 (0x508), region = 60  ;;  %1904 = vmatprep.subr.bf16.mxu0 (!%p325_p9), %v2217_v1  ;;  %1912 = vmatprep.subr.bf16.mxu1 (!%p325_p9), %v2217_v1  ;;  %v2096_v5 = vld [vmem:[%s2691_s4] sm:$0xff] (!%p325_p9)   ;;  %vm377_vm2 = vsmask.f32 (!%p325_p9), 256  ;;  %vm521_vm3 = vsmask.f32 (!%p325_p9), 4368 }
   0xf   : > { %1905 = vmatpush3.bf16.msra.mxu0 (!%p325_p9), %v2093_v0  ;;  %1908 = vmatprep.mubr.msk.bf16.mxu0 (!%p325_p9), %vm2218_vm0, %v2217_v1  ;;  %vm2354_vm4 = vmor (!%p325_p9), %vm377_vm2, %vm521_vm3  ;;  %vm470_vm5 = vcmask (!%p325_p9), 1043456   ;;  %v2095_v28 = vld [vmem:[%s2687_s0] sm:$0xff] (!%p325_p9)   ;;  %vm466_vm6 = vcmask (!%p325_p9), 64512   ;;  %vm376_vm7 = vcmask (!%p325_p9), 1040384   ;;  %v2097_v30 = vld [vmem:[%s2691_s4 + $0x8] sm:$0xff] (!%p325_p9)   ;;  %vm387_vm11 = vcmask (!%p325_p9), 516096  }
  0x10   : > { %1906 = vmatprep.subr.bf16.mxu0 (!%p325_p9), %v2217_v1  ;;  %1914 = vmatprep.mubr.msk.bf16.mxu1 (!%p325_p9), %vm2218_vm0, %v2217_v1  ;;  %vm378_vm8 = vmand (!%p325_p9), %vm376_vm7, %vm377_vm2  ;;  %v379_v29 = vld [vmem:[#allocation2] sm:$0x1] (!%p325_p9)  ;;  %vm382_vm9 = vsmask.f32 (!%p325_p9), 7938  ;;  %v384_v32 = vld [vmem:[#allocation2 + $0x8] sm:$0x1] (!%p325_p9) }
  0x11   : > { %v380_v31 = vsel (!%p325_p9), %vm378_vm8, 0, %v379_v29  ;;  %vm383_vm10 = vmand (!%p325_p9), %vm376_vm7, %vm382_vm9  ;;  %v2098_v33 = vld [vmem:[%s2691_s4 + $0x40] sm:$0xff] (!%p325_p9)   ;;  %v2099_v35 = vld [vmem:[%s2691_s4 + $0x10] sm:$0xff] (!%p325_p9)   ;;  %vm543_vm14 = vcmask (!%p325_p9), 519168   ;;  %vm594_vm3 = vcmask (!%p325_p9), 1040896   ;;  %vm1061_vm8 = vcmask (!%p325_p9), 523264  }
  0x12   : > { %381 = vst [vmem:[#allocation2] sm:$0x1] (!%p325_p9), %v380_v31  ;;  %v385_v34 = vsel (!%p325_p9), %vm383_vm10, 0, %v384_v32  ;;  %v2100_v36 = vld [vmem:[%s2691_s4 + $0x48] sm:$0xff] (!%p325_p9)   ;;  %v2101_v37 = vld [vmem:[%s2691_s4 + $0x18] sm:$0xff] (!%p325_p9)   ;;  %v2102_v38 = vld [vmem:[%s2691_s4 + $0x50] sm:$0xff] (!%p325_p9)  }
  0x13   : > { %1907 = vmatpush3.bf16.msra.mxu0 (!%p325_p9), %v2094_v2  ;;  %386 = vst [vmem:[#allocation2 + $0x8] sm:$0x1] (!%p325_p9), %v385_v34  ;;  %v389_v39 = vld [vmem:[#allocation3] sm:$0x1] (!%p325_p9)  ;;  %v393_v40 = vld [vmem:[#allocation3 + $0x8] sm:$0x1] (!%p325_p9)  ;;  %vm2394_vm12 = vmand (!%p325_p9), %vm387_vm11, %vm377_vm2 }
  0x14   : > { %1938 = vmatprep.subr.bf16.mxu0 (!%p325_p9), %v2217_v1  ;;  %v390_v42 = vsel (!%p325_p9), %vm2394_vm12, 0, %v389_v39  ;;  %vm392_vm13 = vmand (!%p325_p9), %vm387_vm11, %vm382_vm9  ;;  %v2103_v44 = vld [vmem:[%s2691_s4 + $0x20] sm:$0xff] (!%p325_p9)   ;;  %v2104_v45 = vld [vmem:[%s2691_s4 + $0x58] sm:$0xff] (!%p325_p9)   ;;  %vm643_vm7 = vsmask.f32 (!%p325_p9), 7424  ;;  %s2220_s12 = smov (!%p325_p9), [#allocation4]  }
  0x15   : > { %s367_s29 = scalar_select %p366_p10, %s2298_s17, 1  ;;  %391 = vst [vmem:[#allocation3] sm:$0x1] %v390_v42  ;;  %v394_v43 = vsel %vm392_vm13, 0, %v393_v40  ;;  %v2105_v46 = vld [vmem:[%s2691_s4 + $0x28] sm:$0xff]   ;;  %v2106_v47 = vld [vmem:[%s2691_s4 + $0x60] sm:$0xff]   ;;  %vm2441_vm15 = vmand %vm543_vm14, %vm382_vm9 }
  0x16   : > { %395 = vst [vmem:[#allocation3 + $0x8] sm:$0x1] %v394_v43  ;;  %v2107_v48 = vld [vmem:[%s2691_s4 + $0x30] sm:$0xff]   ;;  %v2108_v49 = vld [vmem:[%s2691_s4 + $0x68] sm:$0xff]   ;;  %v2109_v50 = vld [vmem:[%s2691_s4 + $0x38] sm:$0xff]  }
  0x17   : > { %s1677_s30 = sshll.u32 %s367_s29, 3  ;;  %s1830_s20 = sshll.u32 %s367_s29, 4  ;;  %v2110_v51 = vld [vmem:[%s2691_s4 + $0x70] sm:$0xff]   ;;  %v2112_v52 = vld [vmem:[%s2691_s4 + $0x78] sm:$0xff]   ;;  %v2115_v32 = vld [vmem:[%s2691_s4 + $0x88] sm:$0xff]  }
  0x18   : > { %s369_s18 = scalar_lea.vmem %s2689_s2, %s1677_s30  ;;  %s374_s26 = scalar_lea.vmem %s2690_s3, %s1830_s20  ;;  %v2117_v34 = vld [vmem:[%s2691_s4 + $0x98] sm:$0xff]   ;;  %v2148_v18 = vld [vmem:[%s2695_s8 + $0x40] sm:$0xff]  }
  0x19   : > { %v396_v3 = vld [vmem:[%s369_s18] sm:$0xff]  ;;  %v554_v7 = vld [vmem:[%s374_s26 + $0x8] sm:$0xff]  ;;  %s2219_s29 = smov 64   ;;  %v2121_v40 = vld [vmem:[%s2691_s4 + $0xb8] sm:$0xff]   ;;  %s363_s30 = sand.u32 1, %s2207_s14  }
  0x1a   : > { %v397_v4 = vpack.c.bf16 %v396_v3, %v396_v3  ;;  %v553_v6 = vld [vmem:[%s374_s26] sm:$0xff]  ;;  %v1834_v9 = vpack.c.bf16 %v554_v7, %v554_v7  ;;  %s1676_s11 = sshll.u32 %s363_s30, 3  ;;  %s1841_s20 = sshll.u32 %s2298_s17, 7 }
  0x1b   : > { %v1833_v8 = vpack.c.bf16 %v553_v6, %v553_v6  ;;  %v545_v2 = vld [vmem:[#allocation2] sm:$0xf]  ;;  %v550_v6 = vld [vmem:[#allocation2 + $0x8] sm:$0x1]  ;;  %s365_s21 = scalar_lea.vmem [#allocation4], %s1676_s11  ;;  %s2638_s28 = scalar_lea.hbm %s2697_s10, %s1841_s20 }
  0x1c   : > { %1909 = vmatmul.mubr.msk.bf16.vlgmr.msra.gmra.mrb[0].mxu0 %vm414_vm1, %v397_v4  ;;  %v570_v12 = vshrl.u32 %v1834_v9, 16  ;;  %v573_v13 = vshll.u32 %v1834_v9, 16  ;;  %vm587_vm1 = vcmask 1043968   ;;  %s1598_s25 = sshll.u32 %s365_s21, 4  ;;  %s2644_s17 = scalar_lea.sflag [#allocation5], %s363_s30  ;;  %s2641_s25 = int_to_ptr.vmem [resolvable:$true] %s1598_s25 }
  0x1d   : > { %1954 = vmatprep.mubr.msk.bf16.mxu0 %vm2218_vm0, %v2217_v1  ;;  %1939 = vmatpush3.bf16.msra.mxu0 %v2096_v5  ;;  %v562_v10 = vshrl.u32 %v1833_v8, 16  ;;  %v565_v11 = vshll.u32 %v1833_v8, 16  ;;  %s2153_s11 = scalar_lea.vmem %s2641_s25, 128  ;;  %s2157_s18 = sshll.u32 %s2220_s12, 4  ;;  %s2158_s18 = int_to_ptr.vmem [resolvable:$false] %s2157_s18 }
  0x1e   : > { %1940 = vmatprep.subr.bf16.mxu0 %v2217_v1  ;;  %v572_v15 = vrot.slane %v570_v12, 7  ;;  %p2154_p11 = scmp.ne.s32.totalorder %s2641_s25, %s2153_s11  ;;  %s2159_s20 = scalar_lea.vmem %s2158_s18, 256 }
  0x1f   : > { %v564_v14 = vrot.slane %v562_v10, 7  ;;  %p2160_p0 = scmp.lt.s32.totalorder %s2641_s25, %s2158_s18  ;;  %p2161_p1 = scmp.lt.s32.totalorder %s2159_s20, %s2153_s11 }
  0x20   : > { %v575_v19 = vor.u32 %v573_v13, %v572_v15  ;;  %v577_v20 = vrot.slane %v572_v15, 4  ;;  %p2155_p12 = pnand %p2154_p11, %p2315_p5 }
  0x21   : > { %v567_v16 = vor.u32 %v565_v11, %v564_v14  ;;  %v568_v17 = vrot.slane %v564_v14, 4  ;;  %1941 = vmatpush3.bf16.msra.mxu0 %v2097_v30  ;;  %v2114_v30 = vld [vmem:[%s2691_s4 + $0x80] sm:$0xff]   ;;  %p2162_p2 = por %p2161_p1, %p2160_p0 }
  0x22   : > { %582 = vrot.lane.b32.xlu1 %v577_v20, %s2219_s29  ;;  %1942 = vmatprep.subr.bf16.mxu0 %v2217_v1  ;;  %p2156_p13 = pneg %p2155_p12 }
  0x23   : > { %578 = vrot.lane.b32.xlu0 %v567_v16, %s2219_s29  ;;  %v576_v21 = vsel %vm2354_vm4, %v568_v17, %v575_v19 }
  0x24   : > { %p2163_p3 = pnand %p2162_p2, %p2156_p13 }
  0x25   : > { %1943 = vmatpush3.bf16.msra.mxu0 %v2099_v35  ;;  %v2118_v35 = vld [vmem:[%s2691_s4 + $0xa0] sm:$0xff]  }
  0x26   : > { %1944 = vmatprep.subr.bf16.mxu0 %v2217_v1 }
  0x27   : > { %580 = vrot.lane.b32.xlu0 %v576_v21, %s2219_s29 }
  0x29   : > { %1945 = vmatpush3.bf16.msra.mxu0 %v2101_v37 }
  0x2a   : > { %1946 = vmatprep.subr.bf16.mxu0 %v2217_v1 }
  0x2d   : > { %1947 = vmatpush3.bf16.msra.mxu0 %v2103_v44 }
  0x2e   : > { %1948 = vmatprep.subr.bf16.mxu0 %v2217_v1 }
  0x31   : > { %1949 = vmatpush3.bf16.msra.mxu0 %v2105_v46  ;;  %v2124_v46 = vld [vmem:[%s2693_s6 + $0x20] sm:$0xff]  }
  0x32   : > { %1950 = vmatprep.subr.bf16.mxu0 %v2217_v1 }
  0x35   : > { %1951 = vmatpush3.bf16.msra.mxu0 %v2107_v48  ;;  %v2126_v48 = vld [vmem:[%s2693_s6 + $0x28] sm:$0xff]  }
  0x36   : > { %1952 = vmatprep.subr.bf16.mxu0 %v2217_v1 }
  0x39   : > { %1953 = vmatpush3.bf16.msra.mxu0 %v2109_v50  ;;  %v2128_v50 = vld [vmem:[%s2693_s6 + $0x30] sm:$0xff]  }
  0x3a   : > { %1978 = vmatprep.subr.bf16.mxu0 %v2217_v1 }
  0x94   : > { %v583_v15 = vpop.permute.xlu1 %582 }
  0x95   : > { %v579_v60 = vpop.permute.xlu0 %578 }
  0x99   : > { %v581_v11 = vpop.permute.xlu0 %580 }
  0xef   : > { %v452_v22 = vpop.f32.mrb[0].mxu0 }
  0xf0   : > { %v460_v23 = vpack.c.bf16 %v452_v22, %v452_v22  ;;  %v1910_v24 = vpop.f32.mrb[1].mxu0 }
  0xf1   : > { %v455_v25 = vpop.f32.mrb[2].mxu0 }
  0xf2   : > { %v1911_v26 = vpop.f32.mrb[3].mxu0  ;;  %v472_v27 = vsel %vm470_vm5, %v460_v23, 0  ;;  %vm588_vm5 = vmand %vm587_vm1, %vm382_vm9 }
  0xf3   : > { %1913 = vmatpush3.bf16.msra.mxu1 %v472_v27 }
  0xf4   : > { %1918 = vmatprep.subr.bf16.mxu1 %v2217_v1 }
  0xf6   : > { %1915 = vmatmul.mubr.msk.bf16.vlgmr.msra.gmra.mrb[0].mxu1 %vm466_vm6, %v2095_v28  ;;  %vm595_vm6 = vmand %vm594_vm3, %vm377_vm2  ;;  %vm857_vm2 = vcmask 1046528  }
  0xf7   : > { %1934 = vmatprep.mubr.msk.bf16.mxu1 %vm2218_vm0, %v2217_v1  ;;  %1919 = vmatpush3.bf16.msra.mxu1 %v2098_v33  ;;  %v2116_v33 = vld [vmem:[%s2691_s4 + $0x90] sm:$0xff]  }
  0xf8   : > { %1920 = vmatprep.subr.bf16.mxu1 %v2217_v1 }
  0xfb   : > { %1921 = vmatpush3.bf16.msra.mxu1 %v2100_v36  ;;  %v2119_v36 = vld [vmem:[%s2691_s4 + $0xa8] sm:$0xff]  }
  0xfc   : > { %1922 = vmatprep.subr.bf16.mxu1 %v2217_v1 }
  0xff   : > { %1923 = vmatpush3.bf16.msra.mxu1 %v2102_v38  ;;  %v2120_v38 = vld [vmem:[%s2691_s4 + $0xb0] sm:$0xff]  }
 0x100   : > { %1924 = vmatprep.subr.bf16.mxu1 %v2217_v1 }
 0x103   : > { %1925 = vmatpush3.bf16.msra.mxu1 %v2104_v45  ;;  %v2123_v45 = vld [vmem:[%s2693_s6 + $0x40] sm:$0xff]  }
 0x104   : > { %1926 = vmatprep.subr.bf16.mxu1 %v2217_v1 }
 0x107   : > { %1927 = vmatpush3.bf16.msra.mxu1 %v2106_v47  ;;  %v2125_v47 = vld [vmem:[%s2693_s6 + $0x48] sm:$0xff]  }
 0x108   : > { %1928 = vmatprep.subr.bf16.mxu1 %v2217_v1 }
 0x10b   : > { %1929 = vmatpush3.bf16.msra.mxu1 %v2108_v49  ;;  %v2127_v49 = vld [vmem:[%s2693_s6 + $0x50] sm:$0xff]  }
 0x10c   : > { %1930 = vmatprep.subr.bf16.mxu1 %v2217_v1 }
 0x10f   : > { %1931 = vmatpush3.bf16.msra.mxu1 %v2110_v51  ;;  %v2129_v51 = vld [vmem:[%s2693_s6 + $0x58] sm:$0xff]  }
 0x110   : > { %1932 = vmatprep.subr.bf16.mxu1 %v2217_v1 }
 0x113   : > { %1933 = vmatpush3.bf16.msra.mxu1 %v2112_v52  ;;  %v2130_v52 = vld [vmem:[%s2693_s6 + $0x38] sm:$0xff]  }
 0x114   : > { %1958 = vmatprep.subr.bf16.mxu1 %v2217_v1 }
 0x1c9   : > { %v508_v53 = vpop.f32.mrb[0].mxu1 }
 0x1ca   : > { %v1831_v54 = vpack.c.bf16 %v508_v53, %v508_v53  ;;  %v1916_v55 = vpop.f32.mrb[1].mxu1 }
 0x1cb   : > { %v511_v56 = vpop.f32.mrb[2].mxu1 }
 0x1cc   : > { %v524_v57 = vshrl.u32 %v1831_v54, 16  ;;  %v1832_v58 = vpack.c.bf16 %v511_v56, %v511_v56  ;;  %v1917_v59 = vpop.f32.mrb[3].mxu1  ;;  %v527_v62 = vshll.u32 %v1831_v54, 16 }
 0x1ce   : > { %v526_v61 = vrot.slane %v524_v57, 7  ;;  %v532_v63 = vshrl.u32 %v1832_v58, 16  ;;  %v535_v5 = vshll.u32 %v1832_v58, 16 }
 0x1d0   : > { %v529_v3 = vor.u32 %v527_v62, %v526_v61  ;;  %v534_v4 = vrot.slane %v532_v63, 7  ;;  %v530_v7 = vrot.slane %v526_v61, 4 }
 0x1d2   : > { %v537_v8 = vor.u32 %v535_v5, %v534_v4  ;;  %v539_v9 = vrot.slane %v534_v4, 4  ;;  %v546_v10 = vsel %vm2441_vm15, %v529_v3, %v545_v2  ;;  %v1748_v2 = vld [vmem:[%s2692_s5] ss:$0 sm:$0xff] }
 0x1d3   : > { %547 = vst [vmem:[#allocation2] sm:$0xf] %v546_v10 }
 0x1d4   : > { %v538_v12 = vsel %vm2354_vm4, %v530_v7, %v537_v8  ;;  %v551_v13 = vsel %vm2394_vm12, %v539_v9, %v550_v6 }
 0x1d5   : > { %549 = vst.msk [vmem:[#allocation2 + $0x4] sm:$0xf] %vm543_vm14, %v538_v12  ;;  %552 = vst [vmem:[#allocation2 + $0x8] sm:$0x1] %v551_v13 }
 0x1d6   : > { %593 = vst.msk [vmem:[#allocation2 + $0x4] sm:$0xf] %vm587_vm1, %v581_v11 }
 0x1da   : > { %v589_v14 = vld [vmem:[#allocation2] sm:$0xf] }
 0x1db   : > { %v590_v16 = vsel %vm588_vm5, %v579_v60, %v589_v14 }
 0x1dc   : > { %591 = vst [vmem:[#allocation2] sm:$0xf] %v590_v16  ;;  %v596_v17 = vld [vmem:[#allocation2 + $0x8] sm:$0x1] }
 0x1dd   : > { %v597_v19 = vsel %vm595_vm6, %v583_v15, %v596_v17  ;;  %v600_v20 = vld [vmem:[#allocation2 + $0x4] sm:$0xf] }
 0x1de   : > { %598 = vst [vmem:[#allocation2 + $0x8] sm:$0x1] %v597_v19  ;;  %v990_v19 = vld [vmem:[#allocation3] sm:$0xf] }
 0x1e3   : > { %v599_v21 = vld [vmem:[#allocation2] sm:$0xf] }
 0x1e4   : > { %v1705_v22 = vcombine.low %v599_v21, %v600_v20  ;;  %v836_v37 = vld [vmem:[#allocation2] sm:$0xe] }
 0x1e5   : > { %v2113_v23 = vld [vmem:[#allocation2 + $0x8] ss:$0 sps:$4 sm:$0x11]   ;;  %v1739_v39 = vcombine.low %v836_v37, %v600_v20 }
 0x1e6   : > { %1955 = vmatmul.mubr.bf16.vlgmr.msra.gmra.mrb[4].mxu0 %v1705_v22  ;;  %v647_v24 = vshll.u32 %v1705_v22, 16  ;;  %v652_v25 = vshll.u32 %v2113_v23, 16  ;;  %v645_v26 = vshrl.u32 %v1705_v22, 16  ;;  %v859_v43 = vrot.slane %v2113_v23, 1  ;;  %v994_v23 = vld [vmem:[#allocation3 + $0x8] sm:$0x1] }
 0x1e7   : > { %1986 = vmatprep.mubr.msk.bf16.mxu0 %vm2218_vm0, %v2217_v1  ;;  %v858_v42 = vrot.slane %v1739_v39, 1  ;;  %1979 = vmatpush3.bf16.msra.mxu0 %v2124_v46  ;;  %v2134_v46 = vld [vmem:[%s2693_s6] sm:$0xff]  }
 0x1e8   : > { %v649_v27 = vrot.slane %v647_v24, 1  ;;  %v654_v28 = vrot.slane %v652_v25, 1  ;;  %1980 = vmatprep.subr.bf16.mxu0 %v2217_v1 }
 0x1e9   : > { %v860_v44 = vsel %vm857_vm2, %v858_v42, %v859_v43 }
 0x1ea   : > { %v650_v29 = vor.u32 %v649_v27, %v645_v26 }
 0x1eb   : > { %1981 = vmatpush3.bf16.msra.mxu0 %v2126_v48  ;;  %v2135_v48 = vld [vmem:[%s2693_s6 + $0x8] sm:$0xff]  }
 0x1ec   : > { %v655_v31 = vsel %vm643_vm7, %v650_v29, %v654_v28  ;;  %1982 = vmatprep.subr.bf16.mxu0 %v2217_v1 }
 0x1ed   : > { %1935 = vmatmul.mubr.bf16.vlgmr.msra.gmra.mrb[4].mxu1 %v655_v31 }
 0x1ee   : > { %1959 = vmatpush3.bf16.msra.mxu1 %v2114_v30  ;;  %1974 = vmatprep.mubr.msk.bf16.mxu1 %vm2218_vm0, %v2217_v1 }
 0x1ef   : > { %1960 = vmatprep.subr.bf16.mxu1 %v2217_v1  ;;  %1983 = vmatpush3.bf16.msra.mxu0 %v2128_v50  ;;  %v2137_v50 = vld [vmem:[%s2693_s6 + $0x18] sm:$0xff]  }
 0x1f0   : > { %1984 = vmatprep.subr.bf16.mxu0 %v2217_v1 }
 0x1f2   : > { %1961 = vmatpush3.bf16.msra.mxu1 %v2115_v32 }
 0x1f3   : > { %1962 = vmatprep.subr.bf16.mxu1 %v2217_v1  ;;  %1985 = vmatpush3.bf16.msra.mxu0 %v2130_v52  ;;  %v2139_v52 = vld [vmem:[%s2695_s8 + $0x8] sm:$0xff]  }
 0x1f4   : > { %1990 = vmatprep.subr.bf16.mxu0 %v2217_v1 }
 0x1f6   : > { %1963 = vmatpush3.bf16.msra.mxu1 %v2116_v33 }
 0x1f7   : > { %1964 = vmatprep.subr.bf16.mxu1 %v2217_v1 }
 0x1fa   : > { %1965 = vmatpush3.bf16.msra.mxu1 %v2117_v34 }
 0x1fb   : > { %1966 = vmatprep.subr.bf16.mxu1 %v2217_v1 }
 0x1fe   : > { %1967 = vmatpush3.bf16.msra.mxu1 %v2118_v35 }
 0x1ff   : > { %1968 = vmatprep.subr.bf16.mxu1 %v2217_v1 }
 0x202   : > { %1969 = vmatpush3.bf16.msra.mxu1 %v2119_v36 }
 0x203   : > { %1970 = vmatprep.subr.bf16.mxu1 %v2217_v1 }
 0x206   : > { %1971 = vmatpush3.bf16.msra.mxu1 %v2120_v38 }
 0x207   : > { %1972 = vmatprep.subr.bf16.mxu1 %v2217_v1 }
 0x20a   : > { %1973 = vmatpush3.bf16.msra.mxu1 %v2121_v40 }
 0x20b   : > { %2002 = vmatprep.subr.bf16.mxu1 %v2217_v1 }
 0x20d   : > { %1975 = vmatmul.mubr.bf16.vlgmr.msra.gmra.mrb[8].mxu1 %v860_v44 }
 0x20e   : > { %2010 = vmatprep.mubr.msk.bf16.mxu1 %vm2218_vm0, %v2217_v1  ;;  %2003 = vmatpush3.bf16.msra.mxu1 %v2123_v45 }
 0x20f   : > { %2004 = vmatprep.subr.bf16.mxu1 %v2217_v1 }
 0x212   : > { %2005 = vmatpush3.bf16.msra.mxu1 %v2125_v47 }
 0x213   : > { %2006 = vmatprep.subr.bf16.mxu1 %v2217_v1 }
 0x216   : > { %2007 = vmatpush3.bf16.msra.mxu1 %v2127_v49  ;;  %v2136_v49 = vld [vmem:[%s2693_s6 + $0x10] sm:$0xff]  }
 0x217   : > { %2008 = vmatprep.subr.bf16.mxu1 %v2217_v1 }
 0x21a   : > { %2009 = vmatpush3.bf16.msra.mxu1 %v2129_v51  ;;  %v2138_v51 = vld [vmem:[%s2695_s8] sm:$0xff]  }
 0x21b   : > { %2026 = vmatprep.subr.bf16.mxu1 %v2217_v1 }
 0x2b9   : > { %v829_v53 = vpop.f32.mrb[4].mxu0 }
 0x2ba   : > { %v1956_v54 = vpop.f32.mrb[5].mxu0 }
 0x2bb   : > { %v832_v55 = vpop.f32.mrb[6].mxu0  ;;  %v2141_v54 = vld [vmem:[%s2695_s8 + $0x10] sm:$0xff]  }
 0x2bc   : > { %v1957_v56 = vpop.f32.mrb[7].mxu0 }
 0x2bd   : > { %v2143_v56 = vld [vmem:[%s2695_s8 + $0x18] sm:$0xff]  }
 0x2c0   : > { %v739_v57 = vpop.f32.mrb[4].mxu1 }
 0x2c1   : > { %v830_v58 = vadd.f32 %v829_v53, %v739_v57  ;;  %v1936_v59 = vpop.f32.mrb[5].mxu1  ;;  %v2140_v53 = vld [vmem:[%s2695_s8 + $0x20] sm:$0xff]   ;;  %v2144_v57 = vld [vmem:[%s2695_s8 + $0x30] sm:$0xff]  }
 0x2c2   : > { %v742_v60 = vpop.f32.mrb[6].mxu1 }
 0x2c3   : > { %v833_v61 = vadd.f32 %v832_v55, %v742_v60  ;;  %v1937_v62 = vpop.f32.mrb[7].mxu1  ;;  %v2142_v55 = vld [vmem:[%s2695_s8 + $0x28] sm:$0xff]  }
 0x2e0   : > { %v944_v63 = vpop.f32.mrb[8].mxu1 }
 0x2e1   : > { %v951_v3 = vadd.f32 %v944_v63, %v830_v58  ;;  %v1976_v4 = vpop.f32.mrb[9].mxu1  ;;  %v2146_v58 = vld [vmem:[%s2695_s8 + $0x38] sm:$0xff]  }
 0x2e2   : > { %v947_v5 = vpop.f32.mrb[10].mxu1 }
 0x2e3   : > { %v960_v6 = vadd.f32 %v1748_v2, %v951_v3  ;;  %v952_v7 = vadd.f32 %v947_v5, %v833_v61  ;;  %v1977_v8 = vpop.f32.mrb[11].mxu1 }
 0x2e4   : > { %v1785_v8 = vld [vmem:[%s2694_s7] ss:$0 sm:$0xff] }
 0x2e5   : > { %v962_v9 = vmax.f32 %v960_v6, 0.0  ;;  %v961_v10 = vadd.f32 %v1748_v2, %v952_v7 }
 0x2e7   : > { %v1835_v11 = vpack.c.bf16 %v962_v9, %v962_v9  ;;  %v963_v12 = vmax.f32 %v961_v10, 0.0 }
 0x2e9   : > { %v971_v13 = vshrl.u32 %v1835_v11, 16  ;;  %v1836_v14 = vpack.c.bf16 %v963_v12, %v963_v12  ;;  %v974_v16 = vshll.u32 %v1835_v11, 16 }
 0x2eb   : > { %v973_v15 = vrot.slane %v971_v13, 7  ;;  %v979_v17 = vshrl.u32 %v1836_v14, 16  ;;  %v982_v22 = vshll.u32 %v1836_v14, 16 }
 0x2ed   : > { %v976_v20 = vor.u32 %v974_v16, %v973_v15  ;;  %v981_v21 = vrot.slane %v979_v17, 7  ;;  %v977_v24 = vrot.slane %v973_v15, 4 }
 0x2ef   : > { %v991_v25 = vsel %vm2441_vm15, %v976_v20, %v990_v19  ;;  %v984_v26 = vor.u32 %v982_v22, %v981_v21  ;;  %v986_v27 = vrot.slane %v981_v21, 4 }
 0x2f0   : > { %992 = vst [vmem:[#allocation3] sm:$0xf] %v991_v25 }
 0x2f1   : > { %v985_v28 = vsel %vm2354_vm4, %v977_v24, %v984_v26  ;;  %v995_v29 = vsel %vm2394_vm12, %v986_v27, %v994_v23 }
 0x2f2   : > { %993 = vst.msk [vmem:[#allocation3 + $0x4] sm:$0xf] %vm543_vm14, %v985_v28  ;;  %996 = vst [vmem:[#allocation3 + $0x8] sm:$0x1] %v995_v29 }
 0x2f7   : > { %v2536_v30 = vld [vmem:[#allocation3] sm:$0xf] }
 0x2f8   : > { %v1173_v32 = vld [vmem:[#allocation3] sm:$0xe] }
 0x2f9   : > { %v998_v31 = vld [vmem:[#allocation3 + $0x4] sm:$0xf]  ;;  %v2132_v34 = vld [vmem:[#allocation3 + $0x8] ss:$0 sps:$4 sm:$0x11]  }
 0x2fa   : > { %v1759_v33 = vcombine.low %v2536_v30, %v998_v31  ;;  %v1779_v35 = vcombine.low %v1173_v32, %v998_v31  ;;  %v1187_v37 = vrot.slane %v2132_v34, 1  ;;  %v1033_v39 = vshll.u32 %v2132_v34, 16 }
 0x2fc   : > { %v1186_v36 = vrot.slane %v1779_v35, 1  ;;  %v1028_v38 = vshll.u32 %v1759_v33, 16  ;;  %v1026_v42 = vshrl.u32 %v1759_v33, 16  ;;  %v1035_v45 = vrot.slane %v1033_v39, 1 }
 0x2fe   : > { %v1188_v40 = vsel %vm857_vm2, %v1186_v36, %v1187_v37  ;;  %v1030_v43 = vrot.slane %v1028_v38, 1 }
 0x2ff   : > { %2011 = vmatmul.mubr.msk.bf16.vlgmr.msra.gmra.mrb[12].mxu1 %vm1061_vm8, %v1188_v40 }
 0x300   : > { %v1031_v44 = vor.u32 %v1030_v43, %v1026_v42  ;;  %2034 = vmatprep.mubr.msk.bf16.mxu1 %vm2218_vm0, %v2217_v1  ;;  %2027 = vmatpush3.bf16.msra.mxu1 %v2138_v51 }
 0x301   : > { %2028 = vmatprep.subr.bf16.mxu1 %v2217_v1 }
 0x302   : > { %v1036_v47 = vsel %vm643_vm7, %v1031_v44, %v1035_v45  ;;  %v2149_v45 = vld [vmem:[%s2695_s8 + $0x48] sm:$0xff]  }
 0x303   : > { %1987 = vmatmul.mubr.msk.bf16.vlgmr.msra.gmra.mrb[8].mxu0 %vm1061_vm8, %v1036_v47 }
 0x304   : > { %1991 = vmatpush3.bf16.msra.mxu0 %v2134_v46  ;;  %1998 = vmatprep.mubr.msk.bf16.mxu0 %vm2218_vm0, %v2217_v1  ;;  %v2150_v46 = vld [vmem:[%s2695_s8 + $0x50] sm:$0xff]  }
 0x305   : > { %1992 = vmatprep.subr.bf16.mxu0 %v2217_v1  ;;  %2029 = vmatpush3.bf16.msra.mxu1 %v2139_v52 }
 0x306   : > { %2030 = vmatprep.subr.bf16.mxu1 %v2217_v1 }
 0x308   : > { %1993 = vmatpush3.bf16.msra.mxu0 %v2135_v48 }
 0x309   : > { %1994 = vmatprep.subr.bf16.mxu0 %v2217_v1  ;;  %2031 = vmatpush3.bf16.msra.mxu1 %v2141_v54 }
 0x30a   : > { %2032 = vmatprep.subr.bf16.mxu1 %v2217_v1 }
 0x30c   : > { %1995 = vmatpush3.bf16.msra.mxu0 %v2136_v49  ;;  %v2151_v49 = vld [vmem:[%s2695_s8 + $0x58] sm:$0xff]  }
 0x30d   : > { %1996 = vmatprep.subr.bf16.mxu0 %v2217_v1  ;;  %2033 = vmatpush3.bf16.msra.mxu1 %v2143_v56 }
 0x310   : > { %1997 = vmatpush3.bf16.msra.mxu0 %v2137_v50 }
 0x311   : > { %2014 = vmatprep.subr.bf16.mxu0 %v2217_v1 }
 0x313   : > { %1999 = vmatmul.mubr.msk.bf16.vlgmr.msra.gmra.mrb[12].mxu0 %vm1061_vm8, %v1759_v33  ;;  %v1299_v33 = vld [vmem:[#allocation3 + $0x8] sm:$0x1] }
 0x314   : > { %2022 = vmatprep.mubr.msk.bf16.mxu0 %vm2218_vm0, %v2217_v1  ;;  %2015 = vmatpush3.bf16.msra.mxu0 %v2140_v53 }
 0x315   : > { %2016 = vmatprep.subr.bf16.mxu0 %v2217_v1 }
 0x318   : > { %2017 = vmatpush3.bf16.msra.mxu0 %v2142_v55 }
 0x319   : > { %2018 = vmatprep.subr.bf16.mxu0 %v2217_v1 }
 0x31c   : > { %2019 = vmatpush3.bf16.msra.mxu0 %v2144_v57 }
 0x31d   : > { %2020 = vmatprep.subr.bf16.mxu0 %v2217_v1 }
 0x320   : > { %2021 = vmatpush3.bf16.msra.mxu0 %v2146_v58 }
 0x321   : > { %2038 = vmatprep.subr.bf16.mxu0 %v2217_v1 }
 0x3d2   : > { %v1250_v59 = vpop.f32.mrb[12].mxu1 }
 0x3d3   : > { %v2012_v60 = vpop.f32.mrb[13].mxu1 }
 0x3d4   : > { %v1253_v61 = vpop.f32.mrb[14].mxu1 }
 0x3d5   : > { %v2013_v62 = vpop.f32.mrb[15].mxu1 }
 0x3d6   : > { %v1099_v63 = vpop.f32.mrb[8].mxu0 }
 0x3d7   : > { %v1988_v2 = vpop.f32.mrb[9].mxu0 }
 0x3d8   : > { %v1102_v3 = vpop.f32.mrb[10].mxu0 }
 0x3d9   : > { %v1989_v4 = vpop.f32.mrb[11].mxu0 }
 0x3e6   : > { %v1166_v5 = vpop.f32.mrb[12].mxu0 }
 0x3e7   : > { %v1167_v6 = vadd.f32 %v1166_v5, %v1099_v63  ;;  %v2000_v7 = vpop.f32.mrb[13].mxu0  ;;  %v1822_v63 = vld [vmem:[%s2696_s9] ss:$0 sm:$0xff] }
 0x3e8   : > { %v1169_v9 = vpop.f32.mrb[14].mxu0 }
 0x3e9   : > { %v1257_v10 = vadd.f32 %v1250_v59, %v1167_v6  ;;  %v1170_v11 = vadd.f32 %v1169_v9, %v1102_v3  ;;  %v2001_v12 = vpop.f32.mrb[15].mxu0 }
 0x3eb   : > { %v1266_v13 = vadd.f32 %v1785_v8, %v1257_v10  ;;  %v1258_v14 = vadd.f32 %v1253_v61, %v1170_v11 }
 0x3ed   : > { %v1268_v15 = vmax.f32 %v1266_v13, 0.0  ;;  %v1267_v16 = vadd.f32 %v1785_v8, %v1258_v14 }
 0x3ef   : > { %v1837_v17 = vpack.c.bf16 %v1268_v15, %v1268_v15  ;;  %v1269_v19 = vmax.f32 %v1267_v16, 0.0 }
 0x3f1   : > { %v1277_v20 = vshrl.u32 %v1837_v17, 16  ;;  %v1838_v21 = vpack.c.bf16 %v1269_v19, %v1269_v19  ;;  %v1280_v23 = vshll.u32 %v1837_v17, 16 }
 0x3f3   : > { %v1279_v22 = vrot.slane %v1277_v20, 7  ;;  %v1285_v24 = vshrl.u32 %v1838_v21, 16  ;;  %v1288_v27 = vshll.u32 %v1838_v21, 16 }
 0x3f5   : > { %v1282_v25 = vor.u32 %v1280_v23, %v1279_v22  ;;  %v1287_v26 = vrot.slane %v1285_v24, 7  ;;  %v1283_v28 = vrot.slane %v1279_v22, 4 }
 0x3f7   : > { %v1296_v29 = vsel %vm2441_vm15, %v1282_v25, %v2536_v30  ;;  %v1290_v31 = vor.u32 %v1288_v27, %v1287_v26  ;;  %v1292_v32 = vrot.slane %v1287_v26, 4 }
 0x3f8   : > { %1297 = vst [vmem:[#allocation3] sm:$0xf] %v1296_v29 }
 0x3f9   : > { %v1291_v34 = vsel %vm2354_vm4, %v1283_v28, %v1290_v31  ;;  %v1300_v35 = vsel %vm2394_vm12, %v1292_v32, %v1299_v33 }
 0x3fa   : > { %1298 = vst.msk [vmem:[#allocation3 + $0x4] sm:$0xf] %vm543_vm14, %v1291_v34  ;;  %1301 = vst [vmem:[#allocation3 + $0x8] sm:$0x1] %v1300_v35 }
 0x3ff   : > { %v1302_v36 = vld [vmem:[#allocation3] sm:$0xf] }
 0x400   : > { %v1477_v47 = vld [vmem:[#allocation3] sm:$0xe] }
 0x401   : > { %v1303_v37 = vld [vmem:[#allocation3 + $0x4] sm:$0xf]  ;;  %v2147_v39 = vld [vmem:[#allocation3 + $0x8] ss:$0 sps:$4 sm:$0x11]  }
 0x402   : > { %v1796_v38 = vcombine.low %v1302_v36, %v1303_v37  ;;  %v1338_v30 = vshll.u32 %v2147_v39, 16  ;;  %v1816_v48 = vcombine.low %v1477_v47, %v1303_v37  ;;  %v1491_v51 = vrot.slane %v2147_v39, 1 }
 0x404   : > { %2035 = vmatmul.mubr.msk.bf16.vlgmr.msra.gmra.mrb[16].mxu1 %vm1061_vm8, %v1796_v38  ;;  %v1333_v0 = vshll.u32 %v1796_v38, 16  ;;  %v1331_v40 = vshrl.u32 %v1796_v38, 16  ;;  %v1340_v44 = vrot.slane %v1338_v30, 1  ;;  %v1490_v50 = vrot.slane %v1816_v48, 1 }
 0x406   : > { %v1335_v42 = vrot.slane %v1333_v0, 1  ;;  %v1492_v52 = vsel %vm857_vm2, %v1490_v50, %v1491_v51 }
 0x408   : > { %v1336_v43 = vor.u32 %v1335_v42, %v1331_v40 }
 0x40a   : > { %v1341_v41 = vsel %vm643_vm7, %v1336_v43, %v1340_v44 }
 0x40b   : > { %2023 = vmatmul.mubr.msk.bf16.vlgmr.msra.gmra.mrb[16].mxu0 %vm1061_vm8, %v1341_v41 }
 0x40c   : > { %2039 = vmatpush3.bf16.msra.mxu0 %v2148_v18  ;;  %2046 = vmatprep.mubr.msk.bf16.mxu0 %vm2218_vm0, %v2217_v1 }
 0x40d   : > { %2040 = vmatprep.subr.bf16.mxu0 %v2217_v1 }
 0x410   : > { %2041 = vmatpush3.bf16.msra.mxu0 %v2149_v45 }
 0x411   : > { %2042 = vmatprep.subr.bf16.mxu0 %v2217_v1 }
 0x414   : > { %2043 = vmatpush3.bf16.msra.mxu0 %v2150_v46 }
 0x415   : > { %2044 = vmatprep.subr.bf16.mxu0 %v2217_v1 }
 0x418   : > { %2045 = vmatpush3.bf16.msra.mxu0 %v2151_v49 }
 0x41b   : > { %2047 = vmatmul.mubr.msk.bf16.vlgmr.msra.gmra.mrb[20].mxu0 %vm1061_vm8, %v1492_v52 }
 0x4d7   : > { %v1470_v53 = vpop.f32.mrb[16].mxu1 }
 0x4d8   : > { %v2036_v54 = vpop.f32.mrb[17].mxu1 }
 0x4d9   : > { %v1473_v55 = vpop.f32.mrb[18].mxu1 }
 0x4da   : > { %v2037_v56 = vpop.f32.mrb[19].mxu1 }
 0x4de   : > { %v1403_v57 = vpop.f32.mrb[16].mxu0 }
 0x4df   : > { %v1471_v58 = vadd.f32 %v1470_v53, %v1403_v57  ;;  %v2024_v59 = vpop.f32.mrb[17].mxu0 }
 0x4e0   : > { %v1406_v60 = vpop.f32.mrb[18].mxu0 }
 0x4e1   : > { %v1474_v61 = vadd.f32 %v1473_v55, %v1406_v60  ;;  %v2025_v62 = vpop.f32.mrb[19].mxu0 }
 0x4ee   : > { %v1554_v1 = vpop.f32.mrb[20].mxu0 }
 0x4ef   : > { %v1561_v2 = vadd.f32 %v1554_v1, %v1471_v58  ;;  %v2048_v3 = vpop.f32.mrb[21].mxu0 }
 0x4f0   : > { %v1557_v4 = vpop.f32.mrb[22].mxu0 }
 0x4f1   : > { %v1570_v5 = vadd.f32 %v1822_v63, %v1561_v2  ;;  %v1562_v6 = vadd.f32 %v1557_v4, %v1474_v61  ;;  %v2049_v7 = vpop.f32.mrb[23].mxu0 }
 0x4f3   : > { %v1572_v8 = vmax.f32 %v1570_v5, 0.0  ;;  %v1571_v9 = vadd.f32 %v1822_v63, %v1562_v6 }
 0x4f5   : > { %v1839_v10 = vpack.c.bf16 %v1572_v8, %v1572_v8  ;;  %v1573_v11 = vmax.f32 %v1571_v9, 0.0 }
 0x4f7   : > { %1582 = vst.msk [vmem:[%s365_s21] sm:$0xf] %vm543_vm14, %v1839_v10  ;;  %v1840_v12 = vpack.c.bf16 %v1573_v11, %v1573_v11 }
 0x4f9   : > { %1583 = vst.msk [vmem:[%s365_s21 + $0x4] sm:$0xf] %vm543_vm14, %v1840_v12 }
 0x4fa   : > { %2166 = shalt.err (!%p2163_p3)
}
 0x4fb   : > { %s2167_s30 = scalar_lea.hbm %s2638_s28, 128  ;;  %s2171_s27 = scalar_lea.hbm %s2697_s10, 256 }
 0x4fc   : > { %p2168_p4 = scmp.ne.s32.totalorder %s2638_s28, %s2167_s30  ;;  %p2172_p9 = scmp.lt.u32.totalorder %s2638_s28, %s2697_s10 }
 0x4fd   : > { %p2173_p10 = scmp.lt.u32.totalorder %s2171_s27, %s2167_s30  ;;  %p2175_p12 = scmp.lt.u32.totalorder %s2167_s30, %s2638_s28 }
 0x4fe   : > { %p2169_p7 = pnand %p2168_p4, %p2315_p5 }
 0x4ff   : > { %p2174_p11 = por %p2173_p10, %p2172_p9 }
 0x500   : > { %p2170_p8 = pneg %p2169_p7 }
 0x501   : > { %p2176_p13 = por %p2175_p12, %p2174_p11 }
 0x503   : > { %p2177_p0 = pnand %p2176_p13, %p2170_p8 }
 0x505   : > { %2180 = shalt.err (!%p2177_p0)
}
 0x506   : > { %s2221_s11 = smov 4  }
 0x507   : > { %2050 = dma.vmem_to_hbm [thread:$0]  (%p2315_p5), %s2641_s25, 128, %s2638_s28, %s2644_s17, %s2219_s29, %s2219_s29, %s2221_s11  }
 0x508 PF: > { %p2056_p1 = scmp.ge.s32.totalorder %s2215_s16, 2  ;;  %s1613_s20 = sand.u32 1, %s2203_s13  }
 0x509   : > { %s1614_s30 = scalar_lea.sflag [#allocation5], %s1613_s20 }
 0x50a   : > { %p2053_p2 = pnand %p2056_p1, %p2319_p6 }
 0x50c   : > { %2198 = dma.done.wait (!%p2053_p2), %s1614_s30, 128  }
 0x50d   : > { %2200 = vsyncadd (!%p2053_p2), %s1614_s30, 4294967168  ;;  %p20_p3 = scmp.ge.s32.totalorder %s2302_s19, 4   ;;  %s2706_s13 = smov %s2207_s14 }
 0x50e   : > { %s2707_s14 = smov %s2211_s15  ;;  %s2708_s15 = smov %s2313_s22 }
 0x50f   : > { %s2709_s16 = smov %s2302_s19  ;;  %22 = sbr.rel (!%p20_p3) target bundleno = 3 (0x3), region = 104 }
 0x516   :  { %1619 = vsyncpa [#allocation5], 1 }
 0x517   :  { %1621 = vsyncpa [#allocation5 + $0x1], 1 }

</bundles_post_ra>
